<compile_context>
chip_gen: v7x
topology: tpu7x:2x2x1
jax: 0.10.0
libtpu: 0.0.40
codegen_flags: <defaults>
</compile_context>

<pallas_src>
import functools

import jax
import jax.numpy as jnp
from jax.experimental import pallas as pl
from jax.experimental.pallas import tpu as pltpu


# ---------------------------------------------------------------------------
# Interpolation weight construction (PyTorch align_corners=False semantics).
# ---------------------------------------------------------------------------
def _interp_weight_matrix(out_size: int, in_size: int, mode: str) -> jnp.ndarray:
    """Row-interpolation matrix W s.t. (W @ v) resamples a length-in_size axis."""
    i = jnp.arange(out_size, dtype=jnp.float32)
    scale = in_size / out_size
    if mode == "nearest":
        # PyTorch 'nearest': src = floor(dst * scale), clamped.
        src = jnp.floor(i * scale)
        idx = jnp.clip(src, 0, in_size - 1).astype(jnp.int32)
        return jax.nn.one_hot(idx, in_size, dtype=jnp.float32)
    elif mode == "bilinear":
        # PyTorch align_corners=False: src = (dst + 0.5) * scale - 0.5, clamp >= 0.
        src = (i + 0.5) * scale - 0.5
        src = jnp.maximum(src, 0.0)
        x0 = jnp.floor(src)
        lam = src - x0
        x0i = jnp.clip(x0.astype(jnp.int32), 0, in_size - 1)
        x1i = jnp.clip(x0i + 1, 0, in_size - 1)
        w0 = jax.nn.one_hot(x0i, in_size, dtype=jnp.float32) * (1.0 - lam)[:, None]
        w1 = jax.nn.one_hot(x1i, in_size, dtype=jnp.float32) * lam[:, None]
        return w0 + w1
    else:
        # TODO(synk): other interpolate modes (bicubic, trilinear, area) not implemented.
        raise NotImplementedError(f"mode={mode}")


# ---------------------------------------------------------------------------
# Kernels.
# ---------------------------------------------------------------------------
def _interp_kernel_kron(w_ref, x_ref, o_ref):
    # w_ref: (H_in*W_in, P_out)   resident Kronecker resample matrix (compute dtype)
    # x_ref: (b_blk, H_in*W_in)   lane-dense input slab
    # o_ref: (b_blk, P_out)       lane-dense output slab (P_out % 128 == 0)
    x = x_ref[...]
    if x.dtype != w_ref.dtype:
        x = x.astype(w_ref.dtype)
    o_ref[...] = jnp.dot(
        x, w_ref[...], preferred_element_type=jnp.float32
    ).astype(o_ref.dtype)


def _interp_kernel_separable(wh_ref, wwt_ref, x_ref, o_ref):
    # wh_ref : (H_out, H_in), wwt_ref: (W_in, W_out) -- stationary 2D MXU operands.
    # x_ref  : (b_blk, H_in*W_in), o_ref: (b_blk, H_out*W_out)
    bb = x_ref.shape[0]
    h_out, h_in = wh_ref.shape
    w_in, w_out = wwt_ref.shape
    cdt = wh_ref.dtype
    x = x_ref[...]
    if x.dtype != cdt:
        x = x.astype(cdt)

    # Width pass: one big 2D matmul with the batch folded into the rows.
    u = jnp.dot(x.reshape(bb * h_in, w_in), wwt_ref[...],
                preferred_element_type=jnp.float32)            # (bb*H_in, W_out) f32

    # Height pass as a single 2D matmul: Wh @ (H_in, bb*W_out).
    # Intermediate stays in f32 (no bf16 repack; v5e's VPU has no bf16 path).
    ut = u.reshape(bb, h_in, w_out).transpose(1, 0, 2).reshape(h_in, bb * w_out)
    t = jnp.dot(wh_ref[...].astype(jnp.float32), ut,
                preferred_element_type=jnp.float32)            # (H_out, bb*W_out)
    out = t.reshape(h_out, bb, w_out).transpose(1, 0, 2).reshape(bb, h_out * w_out)
    o_ref[...] = out.astype(o_ref.dtype)


# ---------------------------------------------------------------------------
# Sizing helpers.
# ---------------------------------------------------------------------------
_KRON_MAX_IN = 2048                      # H_in*W_in ceiling for Kronecker path
_KRON_MAX_OUT = 4096                     # H_out*W_out ceiling
_KRON_MAX_WEIGHT_BYTES = 8 * 1024 * 1024
_WEIGHT_SINGLE_BUFFER_BYTES = 2 * 1024 * 1024  # only large weights get Buffered(1)


def _vmem_capacity_bytes() -> int:
    """Physical VMEM of the local chip; conservative v7x fallback if unknown."""
    try:
        info = pltpu.get_tpu_info()
        for attr in ("vmem_capacity_bytes", "vmem_size_bytes", "vmem_bytes"):
            v = getattr(info, attr, None)
            if v:
                return int(v)
    except Exception:
        pass
    return 64 * 1024 * 1024


def _pick_batch_block(nc, per_img_bytes, resident_bytes, pack, vmem_phys):
    """Images per grid step, generation-aware."""
    if nc <= pack:
        return int(nc)                                 # single full-array block
    # ~45% of physical VMEM for the pipelined blocks; the rest covers resident
    # weights, Mosaic temporaries and headroom.
    budget = max(per_img_bytes * pack, int(vmem_phys * 0.45) - resident_bytes)
    b_cap = max(pack, budget // per_img_bytes)
    # Target >= 8 grid steps (>= 4 per TensorCore on v7x) so the BlockSpec
    # double buffers actually overlap DMA with compute; each step costs ~0.35us.
    b_target = max(pack, (nc + 7) // 8)
    b_blk = min(int(b_cap), int(b_target), nc)
    b_blk = max(pack, (b_blk // pack) * pack)          # dtype-native sublane pack
    return int(min(b_blk, nc))


# ---------------------------------------------------------------------------
# Public entry point: equivalent of Interpolate(size, mode)(x) for NCHW input.
# ---------------------------------------------------------------------------
@functools.partial(jax.jit, static_argnames=("size", "mode"))
def interpolate(x: jnp.ndarray, size, mode: str = "bilinear") -> jnp.ndarray:
    n, c, h_in, w_in = x.shape
    h_out, w_out = size
    nc = n * c
    hw_in = h_in * w_in
    hw_out = h_out * w_out

    in_it = x.dtype.itemsize
    compute_dtype = jnp.bfloat16 if x.dtype == jnp.bfloat16 else jnp.float32
    cmp_it = jnp.dtype(compute_dtype).itemsize
    pack = max(8, 32 // max(1, in_it))                 # 8 f32 / 16 bf16 / 32 int8
    vmem_phys = _vmem_capacity_bytes()

    wh = _interp_weight_matrix(h_out, h_in, mode)      # (H_out, H_in) f32
    ww = _interp_weight_matrix(w_out, w_in, mode)      # (W_out, W_in) f32

    x2d = x.reshape(nc, hw_in)                         # free contiguous reshape

    p_out = ((hw_out + 127) // 128) * 128              # 128-lane-padded output width
    kron_bytes = hw_in * p_out * cmp_it
    use_kron = (hw_in <= _KRON_MAX_IN and hw_out <= _KRON_MAX_OUT
                and kron_bytes <= _KRON_MAX_WEIGHT_BYTES)

    if use_kron:
        # Full resample matrix (built elementwise in f32, exact), transposed for
        # a right-multiply:  W_full_t[h*W_in+w, o*W_out+p] = Wh[o,h] * Ww[p,w].
        w_full = (wh[:, None, :, None] * ww[None, :, None, :]).reshape(hw_out, hw_in)
        w_full_t = w_full.T
        if p_out != hw_out:
            # Zero-pad so the output store stays an unmasked 128-lane-multiple vst.
            w_full_t = jnp.pad(w_full_t, ((0, 0), (0, p_out - hw_out)))
        w_full_t = w_full_t.astype(compute_dtype)

        single_buf = kron_bytes >= _WEIGHT_SINGLE_BUFFER_BYTES
        per_img = (2 * hw_in * in_it          # double-buffered input block row
                   + 2 * p_out * in_it        # double-buffered output block row
                   + p_out * 4                # f32 matmul result before downcast
                   + hw_in * cmp_it)          # possible cast copy of the input
        resident = kron_bytes * (1 if single_buf else 2)
        b_blk = _pick_batch_block(nc, per_img, resident, pack, vmem_phys)

        w_kwargs = dict(pipeline_mode=pl.Buffered(1)) if single_buf else {}
        in_specs = [
            pl.BlockSpec((hw_in, p_out), lambda i: (0, 0), **w_kwargs),   # resident W
            pl.BlockSpec((b_blk, hw_in), lambda i: (i, 0)),
        ]
        out_spec = pl.BlockSpec((b_blk, p_out), lambda i: (i, 0))
        kernel = _interp_kernel_kron
        args = (w_full_t, x2d)
        out_cols = p_out
    else:
        wh_c = wh.astype(compute_dtype)
        ww_t = ww.T.astype(compute_dtype)
        wbytes = (h_out * h_in + w_in * w_out) * cmp_it
        single_buf = wbytes >= _WEIGHT_SINGLE_BUFFER_BYTES
        per_img = (2 * hw_in * in_it + 2 * hw_out * in_it
                   + 8 * h_in * w_out + 8 * h_out * w_out)   # f32 temps + relayouts
        resident = wbytes * (1 if single_buf else 2)
        b_blk = _pick_batch_block(nc, per_img, resident, pack, vmem_phys)

        w_kwargs = dict(pipeline_mode=pl.Buffered(1)) if single_buf else {}
        in_specs = [
            pl.BlockSpec((h_out, h_in), lambda i: (0, 0), **w_kwargs),
            pl.BlockSpec((w_in, w_out), lambda i: (0, 0), **w_kwargs),
            pl.BlockSpec((b_blk, hw_in), lambda i: (i, 0)),
        ]
        out_spec = pl.BlockSpec((b_blk, hw_out), lambda i: (i, 0))
        kernel = _interp_kernel_separable
        args = (wh_c, ww_t, x2d)
        out_cols = hw_out
        # TODO(synk): pad hw_out to a 128-lane multiple in the separable path too
        # (needs a padded Ww layout); only matters for odd resize targets.

    grid = (max(1, (nc + b_blk - 1) // b_blk),)

    out2d = pl.pallas_call(
        kernel,
        out_shape=jax.ShapeDtypeStruct((nc, out_cols), x.dtype),
        grid_spec=pltpu.PrefetchScalarGridSpec(
            num_scalar_prefetch=0,
            grid=grid,
            in_specs=in_specs,
            out_specs=out_spec,
        ),
        compiler_params=pltpu.CompilerParams(
            dimension_semantics=("parallel",),
            vmem_limit_bytes=int(vmem_phys * 0.75)),
    )(*args)

    if out_cols != hw_out:
        out2d = out2d[:, :hw_out]
    # TODO(synk): plain astype truncates for integer dtypes (rare PyTorch usage).
    return out2d.reshape(n, c, h_out, w_out)


# ---------------------------------------------------------------------------
# Pure-JAX reference (PyTorch align_corners=False semantics).
# ---------------------------------------------------------------------------
def _reference(x, size, mode):
    n, c, h_in, w_in = x.shape
    h_out, w_out = size
    wh = _interp_weight_matrix(h_out, h_in, mode)
    ww = _interp_weight_matrix(w_out, w_in, mode)
    return jnp.einsum("oh,nchw,pw->ncop", wh, x.astype(jnp.float32), ww).astype(x.dtype)


if __name__ == "__main__":
    key = jax.random.PRNGKey(0)
    # Module config: upsample 16x16 -> 32x32, bilinear, align_corners=False.
    size = (32, 32)
    mode = "bilinear"
    x = jax.random.normal(key, (2, 4, 16, 16), dtype=jnp.float32)

    out = interpolate(x, size=size, mode=mode)
    out = jax.block_until_ready(out)
    ref = _reference(x, size, mode)
    assert out.shape == (2, 4, 32, 32)
    assert jnp.allclose(out, ref, atol=1e-4, rtol=1e-4), float(jnp.max(jnp.abs(out - ref)))

    # Also exercise the 'nearest' mode and the non-128-multiple output padding path.
    out_nn = jax.block_until_ready(interpolate(x, size=(8, 24), mode="nearest"))
    ref_nn = _reference(x, (8, 24), "nearest")
    assert out_nn.shape == (2, 4, 8, 24)
    assert jnp.allclose(out_nn, ref_nn, atol=1e-4, rtol=1e-4)

    print("KERNEL_OK")
</pallas_src>

<mosaic_0001>
module attributes {stable_mosaic.version = 11 : i64} {
  func.func @_interp_kernel_kron(%arg0: i32, %arg1: memref<256x1024xf32, #tpu.memory_space<vmem>>, %arg2: memref<8x256xf32, #tpu.memory_space<vmem>>, %arg3: memref<8x1024xf32, #tpu.memory_space<vmem>>) attributes {dimension_semantics = [#tpu.dimension_semantics<parallel>], iteration_bounds = array<i64: 1>, scalar_prefetch = 0 : i64, scratch_operands = 0 : i64, tpu.core_type = #tpu.core_type<tc>, window_params = [{pipeline_mode = #tpu.pipeline_mode<synchronous>, transform_indices = @transform_0, window_bounds = array<i64: 256, 1024>}, {transform_indices = @transform_1, window_bounds = array<i64: 8, 256>}, {transform_indices = @transform_2, window_bounds = array<i64: 8, 1024>}]} {
    %c0 = arith.constant 0 : index
    %c0_0 = arith.constant 0 : index
    %0 = vector.load %arg2[%c0, %c0_0] : memref<8x256xf32, #tpu.memory_space<vmem>>, vector<8x256xf32>
    %c0_1 = arith.constant 0 : index
    %c0_2 = arith.constant 0 : index
    %1 = vector.load %arg1[%c0_1, %c0_2] : memref<256x1024xf32, #tpu.memory_space<vmem>>, vector<256x1024xf32>
    %cst = arith.constant dense<0.000000e+00> : vector<8x1024xf32>
    %2 = tpu.matmul %0, %1, %cst {dimension_numbers = #tpu.dot_dimension_numbers<[1], [0], [0], [1], [0, 0, 1, 1], [], []>} : vector<8x256xf32>, vector<256x1024xf32>, vector<8x1024xf32> -> vector<8x1024xf32>
    %c0_3 = arith.constant 0 : index
    %c0_4 = arith.constant 0 : index
    %3 = vector.load %arg3[%c0_3, %c0_4] : memref<8x1024xf32, #tpu.memory_space<vmem>>, vector<8x1024xf32>
    tpu.vector_store %arg3[%c0_3, %c0_4], %2 {strides = array<i32>} : memref<8x1024xf32, #tpu.memory_space<vmem>>, vector<8x1024xf32>,
    return
  }
  func.func @transform_0(%arg0: i32) -> (i32, i32) {
    %c0_i32 = arith.constant 0 : i32
    %c0_i32_0 = arith.constant 0 : i32
    %c0_i32_1 = arith.constant 0 : i32
    return %c0_i32, %c0_i32_0 : i32, i32
  }
  func.func @transform_1(%arg0: i32) -> (i32, i32) {
    %c0_i32 = arith.constant 0 : i32
    %c0_i32_0 = arith.constant 0 : i32
    return %arg0, %c0_i32 : i32, i32
  }
  func.func @transform_2(%arg0: i32) -> (i32, i32) {
    %c0_i32 = arith.constant 0 : i32
    %c0_i32_0 = arith.constant 0 : i32
    return %arg0, %c0_i32 : i32, i32
  }
}

</mosaic_0001>

<bundles_post_ra>
// kernel: interpolate.1
= control target key start
LH: loop header
LB: loop body
LE: loop exit
PB: predicated region body
PF: predicated region fallthrough
CT: control target
= control target key end

     0   :  { %s1646_s0 = inlined_call_operand.vmem [shape: f32[256,1024], index: 0, kind: input, shape index: {}]   ;;  %s1647_s1 = inlined_call_operand.vmem [shape: f32[8,256], index: 1, kind: input, shape index: {}]   ;;  %s1648_s2 = inlined_call_operand.vmem [shape: f32[8,1024], index: 2, kind: output, shape index: {}]  }
   0x1   :  { %v14_v0 = vld [vmem:[%s1646_s0 + $0x8] sm:$0xff]  ;;  %v16_v2 = vld [vmem:[%s1646_s0 + $0x18] sm:$0xff]  ;;  %v13_v5 = vld [vmem:[%s1646_s0] sm:$0xff] }
   0x2   :  { %v22_v1 = vld [vmem:[%s1646_s0 + $0x48] sm:$0xff]  ;;  %v24_v4 = vld [vmem:[%s1646_s0 + $0x58] sm:$0xff]  ;;  %v21_v6 = vld [vmem:[%s1646_s0 + $0x40] sm:$0xff] }
   0x3   :  { %v565_v3 = vpack.c.bf16 %v22_v1, %v14_v0  ;;  %v629_v7 = vpack.c.bf16 %v24_v4, %v16_v2  ;;  %v567_v8 = vpack.c.bf16 %v21_v6, %v13_v5  ;;  %v15_v9 = vld [vmem:[%s1646_s0 + $0x10] sm:$0xff]  ;;  %v30_v11 = vld [vmem:[%s1646_s0 + $0x88] sm:$0xff]  ;;  %v32_v14 = vld [vmem:[%s1646_s0 + $0x98] sm:$0xff] }
   0x4   :  { %v23_v10 = vld [vmem:[%s1646_s0 + $0x50] sm:$0xff]  ;;  %v38_v13 = vld [vmem:[%s1646_s0 + $0xc8] sm:$0xff]  ;;  %v40_v15 = vld [vmem:[%s1646_s0 + $0xd8] sm:$0xff] }
   0x5   :  { %566 = vmatprep.subr.bf16.mxu0 %v565_v3  ;;  %v631_v12 = vpack.c.bf16 %v23_v10, %v15_v9  ;;  %630 = vmatprep.subr.bf16.mxu1 %v629_v7  ;;  %v569_v16 = vpack.c.bf16 %v38_v13, %v30_v11  ;;  %v633_v17 = vpack.c.bf16 %v40_v15, %v32_v14  ;;  %v29_v18 = vld [vmem:[%s1646_s0 + $0x80] sm:$0xff]  ;;  %v31_v20 = vld [vmem:[%s1646_s0 + $0x90] sm:$0xff]  ;;  %v46_v23 = vld [vmem:[%s1646_s0 + $0x108] sm:$0xff] }
   0x6   :  { %568 = vmatpush1.bf16.msra.mxu0 %v567_v8  ;;  %v37_v19 = vld [vmem:[%s1646_s0 + $0xc0] sm:$0xff]  ;;  %v39_v22 = vld [vmem:[%s1646_s0 + $0xd0] sm:$0xff]  ;;  %v54_v24 = vld [vmem:[%s1646_s0 + $0x148] sm:$0xff] }
   0x7   :  { %632 = vmatpush1.bf16.msra.mxu1 %v631_v12  ;;  %v571_v21 = vpack.c.bf16 %v37_v19, %v29_v18  ;;  %570 = vmatprep.subr.bf16.mxu0 %v569_v16  ;;  %v635_v25 = vpack.c.bf16 %v39_v22, %v31_v20  ;;  %v573_v26 = vpack.c.bf16 %v54_v24, %v46_v23  ;;  %v48_v27 = vld [vmem:[%s1646_s0 + $0x118] sm:$0xff]  ;;  %v45_v29 = vld [vmem:[%s1646_s0 + $0x100] sm:$0xff]  ;;  %v47_v32 = vld [vmem:[%s1646_s0 + $0x110] sm:$0xff] }
   0x8   :  { %634 = vmatprep.subr.bf16.mxu1 %v633_v17  ;;  %v56_v28 = vld [vmem:[%s1646_s0 + $0x158] sm:$0xff]  ;;  %v53_v31 = vld [vmem:[%s1646_s0 + $0x140] sm:$0xff]  ;;  %v55_v33 = vld [vmem:[%s1646_s0 + $0x150] sm:$0xff] }
   0x9   :  { %v637_v30 = vpack.c.bf16 %v56_v28, %v48_v27  ;;  %v575_v34 = vpack.c.bf16 %v53_v31, %v45_v29  ;;  %v62_v35 = vld [vmem:[%s1646_s0 + $0x188] sm:$0xff]  ;;  %v64_v37 = vld [vmem:[%s1646_s0 + $0x198] sm:$0xff]  ;;  %v639_v38 = vpack.c.bf16 %v55_v33, %v47_v32  ;;  %v61_v41 = vld [vmem:[%s1646_s0 + $0x180] sm:$0xff] }
   0xa   :  { %572 = vmatpush1.bf16.msra.mxu0 %v571_v21  ;;  %v70_v36 = vld [vmem:[%s1646_s0 + $0x1c8] sm:$0xff]  ;;  %v72_v40 = vld [vmem:[%s1646_s0 + $0x1d8] sm:$0xff]  ;;  %v69_v42 = vld [vmem:[%s1646_s0 + $0x1c0] sm:$0xff] }
   0xb   :  { %636 = vmatpush1.bf16.msra.mxu1 %v635_v25  ;;  %574 = vmatprep.subr.bf16.mxu0 %v573_v26  ;;  %v577_v39 = vpack.c.bf16 %v70_v36, %v62_v35  ;;  %v641_v43 = vpack.c.bf16 %v72_v40, %v64_v37  ;;  %v63_v44 = vld [vmem:[%s1646_s0 + $0x190] sm:$0xff]  ;;  %v78_v46 = vld [vmem:[%s1646_s0 + $0x208] sm:$0xff]  ;;  %v80_v48 = vld [vmem:[%s1646_s0 + $0x218] sm:$0xff]  ;;  %v579_v50 = vpack.c.bf16 %v69_v42, %v61_v41 }
   0xc   :  { %638 = vmatprep.subr.bf16.mxu1 %v637_v30  ;;  %v71_v45 = vld [vmem:[%s1646_s0 + $0x1d0] sm:$0xff]  ;;  %v86_v47 = vld [vmem:[%s1646_s0 + $0x248] sm:$0xff]  ;;  %v88_v49 = vld [vmem:[%s1646_s0 + $0x258] sm:$0xff] }
   0xd   :  { %v643_v51 = vpack.c.bf16 %v71_v45, %v63_v44  ;;  %v581_v52 = vpack.c.bf16 %v86_v47, %v78_v46  ;;  %v77_v53 = vld [vmem:[%s1646_s0 + $0x200] sm:$0xff]  ;;  %v79_v55 = vld [vmem:[%s1646_s0 + $0x210] sm:$0xff]  ;;  %v645_v56 = vpack.c.bf16 %v88_v49, %v80_v48  ;;  %v94_v58 = vld [vmem:[%s1646_s0 + $0x288] sm:$0xff] }
   0xe   :  { %576 = vmatpush1.bf16.msra.mxu0 %v575_v34  ;;  %v85_v54 = vld [vmem:[%s1646_s0 + $0x240] sm:$0xff]  ;;  %v87_v57 = vld [vmem:[%s1646_s0 + $0x250] sm:$0xff]  ;;  %v102_v59 = vld [vmem:[%s1646_s0 + $0x2c8] sm:$0xff] }
   0xf   :  { %640 = vmatpush1.bf16.msra.mxu1 %v639_v38  ;;  %578 = vmatprep.subr.bf16.mxu0 %v577_v39  ;;  %v96_v60 = vld [vmem:[%s1646_s0 + $0x298] sm:$0xff]  ;;  %v583_v62 = vpack.c.bf16 %v85_v54, %v77_v53  ;;  %v647_v63 = vpack.c.bf16 %v87_v57, %v79_v55  ;;  %v585_v0 = vpack.c.bf16 %v102_v59, %v94_v58  ;;  %v93_v1 = vld [vmem:[%s1646_s0 + $0x280] sm:$0xff]  ;;  %v95_v3 = vld [vmem:[%s1646_s0 + $0x290] sm:$0xff] }
  0x10   :  { %642 = vmatprep.subr.bf16.mxu1 %v641_v43  ;;  %v104_v61 = vld [vmem:[%s1646_s0 + $0x2d8] sm:$0xff]  ;;  %v101_v2 = vld [vmem:[%s1646_s0 + $0x2c0] sm:$0xff]  ;;  %v103_v5 = vld [vmem:[%s1646_s0 + $0x2d0] sm:$0xff] }
  0x11   :  { %v649_v4 = vpack.c.bf16 %v104_v61, %v96_v60  ;;  %v110_v6 = vld [vmem:[%s1646_s0 + $0x308] sm:$0xff]  ;;  %v112_v8 = vld [vmem:[%s1646_s0 + $0x318] sm:$0xff]  ;;  %v587_v10 = vpack.c.bf16 %v101_v2, %v93_v1  ;;  %v651_v11 = vpack.c.bf16 %v103_v5, %v95_v3  ;;  %v109_v13 = vld [vmem:[%s1646_s0 + $0x300] sm:$0xff] }
  0x12   :  { %580 = vmatpush1.bf16.msra.mxu0 %v579_v50  ;;  %v118_v7 = vld [vmem:[%s1646_s0 + $0x348] sm:$0xff]  ;;  %v120_v9 = vld [vmem:[%s1646_s0 + $0x358] sm:$0xff]  ;;  %v117_v14 = vld [vmem:[%s1646_s0 + $0x340] sm:$0xff] }
  0x13   :  { %644 = vmatpush1.bf16.msra.mxu1 %v643_v51  ;;  %582 = vmatprep.subr.bf16.mxu0 %v581_v52  ;;  %v589_v12 = vpack.c.bf16 %v118_v7, %v110_v6  ;;  %v111_v15 = vld [vmem:[%s1646_s0 + $0x310] sm:$0xff]  ;;  %v653_v16 = vpack.c.bf16 %v120_v9, %v112_v8  ;;  %v126_v18 = vld [vmem:[%s1646_s0 + $0x388] sm:$0xff]  ;;  %v128_v20 = vld [vmem:[%s1646_s0 + $0x398] sm:$0xff]  ;;  %v591_v22 = vpack.c.bf16 %v117_v14, %v109_v13 }
  0x14   :  { %646 = vmatprep.subr.bf16.mxu1 %v645_v56  ;;  %v119_v17 = vld [vmem:[%s1646_s0 + $0x350] sm:$0xff]  ;;  %v134_v19 = vld [vmem:[%s1646_s0 + $0x3c8] sm:$0xff]  ;;  %v136_v21 = vld [vmem:[%s1646_s0 + $0x3d8] sm:$0xff] }
  0x15   :  { %v655_v23 = vpack.c.bf16 %v119_v17, %v111_v15  ;;  %v593_v24 = vpack.c.bf16 %v134_v19, %v126_v18  ;;  %v125_v25 = vld [vmem:[%s1646_s0 + $0x380] sm:$0xff]  ;;  %v127_v27 = vld [vmem:[%s1646_s0 + $0x390] sm:$0xff]  ;;  %v657_v28 = vpack.c.bf16 %v136_v21, %v128_v20  ;;  %v142_v30 = vld [vmem:[%s1646_s0 + $0x408] sm:$0xff] }
  0x16   :  { %584 = vmatpush1.bf16.msra.mxu0 %v583_v62  ;;  %v133_v26 = vld [vmem:[%s1646_s0 + $0x3c0] sm:$0xff]  ;;  %v135_v29 = vld [vmem:[%s1646_s0 + $0x3d0] sm:$0xff]  ;;  %v150_v31 = vld [vmem:[%s1646_s0 + $0x448] sm:$0xff] }
  0x17   :  { %648 = vmatpush1.bf16.msra.mxu1 %v647_v63  ;;  %586 = vmatprep.subr.bf16.mxu0 %v585_v0  ;;  %v144_v32 = vld [vmem:[%s1646_s0 + $0x418] sm:$0xff]  ;;  %v595_v34 = vpack.c.bf16 %v133_v26, %v125_v25  ;;  %v659_v35 = vpack.c.bf16 %v135_v29, %v127_v27  ;;  %v597_v36 = vpack.c.bf16 %v150_v31, %v142_v30  ;;  %v141_v37 = vld [vmem:[%s1646_s0 + $0x400] sm:$0xff]  ;;  %v143_v39 = vld [vmem:[%s1646_s0 + $0x410] sm:$0xff] }
  0x18   :  { %650 = vmatprep.subr.bf16.mxu1 %v649_v4  ;;  %v152_v33 = vld [vmem:[%s1646_s0 + $0x458] sm:$0xff]  ;;  %v149_v38 = vld [vmem:[%s1646_s0 + $0x440] sm:$0xff]  ;;  %v151_v41 = vld [vmem:[%s1646_s0 + $0x450] sm:$0xff] }
  0x19   :  { %v661_v40 = vpack.c.bf16 %v152_v33, %v144_v32  ;;  %v158_v42 = vld [vmem:[%s1646_s0 + $0x488] sm:$0xff]  ;;  %v160_v44 = vld [vmem:[%s1646_s0 + $0x498] sm:$0xff]  ;;  %v599_v46 = vpack.c.bf16 %v149_v38, %v141_v37  ;;  %v663_v47 = vpack.c.bf16 %v151_v41, %v143_v39  ;;  %v157_v49 = vld [vmem:[%s1646_s0 + $0x480] sm:$0xff] }
  0x1a   :  { %588 = vmatpush1.bf16.msra.mxu0 %v587_v10  ;;  %v166_v43 = vld [vmem:[%s1646_s0 + $0x4c8] sm:$0xff]  ;;  %v168_v45 = vld [vmem:[%s1646_s0 + $0x4d8] sm:$0xff]  ;;  %v165_v50 = vld [vmem:[%s1646_s0 + $0x4c0] sm:$0xff] }
  0x1b   :  { %652 = vmatpush1.bf16.msra.mxu1 %v651_v11  ;;  %590 = vmatprep.subr.bf16.mxu0 %v589_v12  ;;  %v601_v48 = vpack.c.bf16 %v166_v43, %v158_v42  ;;  %v159_v51 = vld [vmem:[%s1646_s0 + $0x490] sm:$0xff]  ;;  %v665_v52 = vpack.c.bf16 %v168_v45, %v160_v44  ;;  %v174_v54 = vld [vmem:[%s1646_s0 + $0x508] sm:$0xff]  ;;  %v176_v56 = vld [vmem:[%s1646_s0 + $0x518] sm:$0xff]  ;;  %v603_v58 = vpack.c.bf16 %v165_v50, %v157_v49 }
  0x1c   :  { %654 = vmatprep.subr.bf16.mxu1 %v653_v16  ;;  %v167_v53 = vld [vmem:[%s1646_s0 + $0x4d0] sm:$0xff]  ;;  %v182_v55 = vld [vmem:[%s1646_s0 + $0x548] sm:$0xff]  ;;  %v184_v57 = vld [vmem:[%s1646_s0 + $0x558] sm:$0xff] }
  0x1d   :  { %v667_v59 = vpack.c.bf16 %v167_v53, %v159_v51  ;;  %v605_v60 = vpack.c.bf16 %v182_v55, %v174_v54  ;;  %v173_v61 = vld [vmem:[%s1646_s0 + $0x500] sm:$0xff]  ;;  %v175_v63 = vld [vmem:[%s1646_s0 + $0x510] sm:$0xff]  ;;  %v669_v0 = vpack.c.bf16 %v184_v57, %v176_v56  ;;  %v190_v2 = vld [vmem:[%s1646_s0 + $0x588] sm:$0xff] }
  0x1e   :  { %592 = vmatpush1.bf16.msra.mxu0 %v591_v22  ;;  %v181_v62 = vld [vmem:[%s1646_s0 + $0x540] sm:$0xff]  ;;  %v183_v1 = vld [vmem:[%s1646_s0 + $0x550] sm:$0xff]  ;;  %v198_v3 = vld [vmem:[%s1646_s0 + $0x5c8] sm:$0xff] }
  0x1f   :  { %656 = vmatpush1.bf16.msra.mxu1 %v655_v23  ;;  %594 = vmatprep.subr.bf16.mxu0 %v593_v24  ;;  %v192_v4 = vld [vmem:[%s1646_s0 + $0x598] sm:$0xff]  ;;  %v607_v6 = vpack.c.bf16 %v181_v62, %v173_v61  ;;  %v189_v7 = vld [vmem:[%s1646_s0 + $0x580] sm:$0xff]  ;;  %v671_v8 = vpack.c.bf16 %v183_v1, %v175_v63  ;;  %v609_v9 = vpack.c.bf16 %v198_v3, %v190_v2  ;;  %v191_v11 = vld [vmem:[%s1646_s0 + $0x590] sm:$0xff] }
  0x20   :  { %658 = vmatprep.subr.bf16.mxu1 %v657_v28  ;;  %v200_v5 = vld [vmem:[%s1646_s0 + $0x5d8] sm:$0xff]  ;;  %v197_v10 = vld [vmem:[%s1646_s0 + $0x5c0] sm:$0xff]  ;;  %v199_v12 = vld [vmem:[%s1646_s0 + $0x5d0] sm:$0xff] }
  0x21   :  { %v673_v13 = vpack.c.bf16 %v200_v5, %v192_v4  ;;  %v206_v14 = vld [vmem:[%s1646_s0 + $0x608] sm:$0xff]  ;;  %v208_v17 = vld [vmem:[%s1646_s0 + $0x618] sm:$0xff]  ;;  %v611_v19 = vpack.c.bf16 %v197_v10, %v189_v7  ;;  %v675_v20 = vpack.c.bf16 %v199_v12, %v191_v11  ;;  %v205_v22 = vld [vmem:[%s1646_s0 + $0x600] sm:$0xff] }
  0x22   :  { %596 = vmatpush1.bf16.msra.mxu0 %v595_v34  ;;  %v214_v15 = vld [vmem:[%s1646_s0 + $0x648] sm:$0xff]  ;;  %v216_v18 = vld [vmem:[%s1646_s0 + $0x658] sm:$0xff]  ;;  %v213_v23 = vld [vmem:[%s1646_s0 + $0x640] sm:$0xff] }
  0x23   :  { %660 = vmatpush1.bf16.msra.mxu1 %v659_v35  ;;  %598 = vmatprep.subr.bf16.mxu0 %v597_v36  ;;  %v1133_v16 = vld [vmem:[%s1647_s1 + $0x8] sm:$0xff]  ;;  %v613_v21 = vpack.c.bf16 %v214_v15, %v206_v14  ;;  %v207_v24 = vld [vmem:[%s1646_s0 + $0x610] sm:$0xff]  ;;  %v677_v25 = vpack.c.bf16 %v216_v18, %v208_v17  ;;  %v224_v29 = vld [vmem:[%s1646_s0 + $0x698] sm:$0xff]  ;;  %v615_v31 = vpack.c.bf16 %v213_v23, %v205_v22 }
  0x24   :  { %662 = vmatprep.subr.bf16.mxu1 %v661_v40  ;;  %333 = vmatprep.mubr.f32.mxu0 %v1133_v16  ;;  %v215_v26 = vld [vmem:[%s1646_s0 + $0x650] sm:$0xff]  ;;  %v222_v27 = vld [vmem:[%s1646_s0 + $0x688] sm:$0xff]  ;;  %v232_v30 = vld [vmem:[%s1646_s0 + $0x6d8] sm:$0xff] }
  0x25   :  { %404 = vmatprep.mubr.f32.mxu1 %v1133_v16  ;;  %v230_v28 = vld [vmem:[%s1646_s0 + $0x6c8] sm:$0xff]  ;;  %v679_v32 = vpack.c.bf16 %v215_v26, %v207_v24  ;;  %v221_v34 = vld [vmem:[%s1646_s0 + $0x680] sm:$0xff]  ;;  %v223_v36 = vld [vmem:[%s1646_s0 + $0x690] sm:$0xff]  ;;  %v681_v37 = vpack.c.bf16 %v232_v30, %v224_v29 }
  0x26   :  { %600 = vmatpush1.bf16.msra.mxu0 %v599_v46  ;;  %v617_v33 = vpack.c.bf16 %v230_v28, %v222_v27  ;;  %v229_v35 = vld [vmem:[%s1646_s0 + $0x6c0] sm:$0xff]  ;;  %v231_v38 = vld [vmem:[%s1646_s0 + $0x6d0] sm:$0xff]  ;;  %v238_v39 = vld [vmem:[%s1646_s0 + $0x708] sm:$0xff] }
  0x27   :  { %664 = vmatpush1.bf16.msra.mxu1 %v663_v47  ;;  %602 = vmatprep.subr.bf16.mxu0 %v601_v48  ;;  %v246_v40 = vld [vmem:[%s1646_s0 + $0x748] sm:$0xff]  ;;  %v240_v41 = vld [vmem:[%s1646_s0 + $0x718] sm:$0xff]  ;;  %v619_v43 = vpack.c.bf16 %v229_v35, %v221_v34  ;;  %v683_v44 = vpack.c.bf16 %v231_v38, %v223_v36  ;;  %v237_v46 = vld [vmem:[%s1646_s0 + $0x700] sm:$0xff] }
  0x28   :  { %666 = vmatprep.subr.bf16.mxu1 %v665_v52  ;;  %v248_v42 = vld [vmem:[%s1646_s0 + $0x758] sm:$0xff]  ;;  %v621_v45 = vpack.c.bf16 %v246_v40, %v238_v39  ;;  %v245_v47 = vld [vmem:[%s1646_s0 + $0x740] sm:$0xff]  ;;  %v239_v48 = vld [vmem:[%s1646_s0 + $0x710] sm:$0xff] }
  0x29   :  { %v685_v49 = vpack.c.bf16 %v248_v42, %v240_v41  ;;  %v247_v50 = vld [vmem:[%s1646_s0 + $0x750] sm:$0xff]  ;;  %v254_v51 = vld [vmem:[%s1646_s0 + $0x788] sm:$0xff]  ;;  %v256_v53 = vld [vmem:[%s1646_s0 + $0x798] sm:$0xff]  ;;  %v623_v55 = vpack.c.bf16 %v245_v47, %v237_v46 }
  0x2a   :  { %604 = vmatpush1.bf16.msra.mxu0 %v603_v58  ;;  %v262_v52 = vld [vmem:[%s1646_s0 + $0x7c8] sm:$0xff]  ;;  %v264_v54 = vld [vmem:[%s1646_s0 + $0x7d8] sm:$0xff]  ;;  %v687_v56 = vpack.c.bf16 %v247_v50, %v239_v48  ;;  %v253_v58 = vld [vmem:[%s1646_s0 + $0x780] sm:$0xff] }
  0x2b   :  { %668 = vmatpush1.bf16.msra.mxu1 %v667_v59  ;;  %606 = vmatprep.subr.bf16.mxu0 %v605_v60  ;;  %v625_v57 = vpack.c.bf16 %v262_v52, %v254_v51  ;;  %v261_v59 = vld [vmem:[%s1646_s0 + $0x7c0] sm:$0xff]  ;;  %v255_v60 = vld [vmem:[%s1646_s0 + $0x790] sm:$0xff]  ;;  %v689_v61 = vpack.c.bf16 %v264_v54, %v256_v53  ;;  %v18_v63 = vld [vmem:[%s1646_s0 + $0x28] sm:$0xff] }
  0x2c   :  { %670 = vmatprep.subr.bf16.mxu1 %v669_v0  ;;  %v263_v62 = vld [vmem:[%s1646_s0 + $0x7d0] sm:$0xff]  ;;  %v26_v0 = vld [vmem:[%s1646_s0 + $0x68] sm:$0xff]  ;;  %v20_v1 = vld [vmem:[%s1646_s0 + $0x38] sm:$0xff]  ;;  %v627_v3 = vpack.c.bf16 %v261_v59, %v253_v58 }
  0x2d   :  { %v28_v2 = vld [vmem:[%s1646_s0 + $0x78] sm:$0xff]  ;;  %v691_v4 = vpack.c.bf16 %v263_v62, %v255_v60  ;;  %v693_v5 = vpack.c.bf16 %v26_v0, %v18_v63  ;;  %v25_v7 = vld [vmem:[%s1646_s0 + $0x60] sm:$0xff]  ;;  %v27_v10 = vld [vmem:[%s1646_s0 + $0x70] sm:$0xff] }
  0x2e   :  { %608 = vmatpush1.bf16.msra.mxu0 %v607_v6  ;;  %v17_v6 = vld [vmem:[%s1646_s0 + $0x20] sm:$0xff]  ;;  %v34_v11 = vld [vmem:[%s1646_s0 + $0xa8] sm:$0xff]  ;;  %v44_v14 = vld [vmem:[%s1646_s0 + $0xf8] sm:$0xff] }
  0x2f   :  { %672 = vmatpush1.bf16.msra.mxu1 %v671_v8  ;;  %610 = vmatprep.subr.bf16.mxu0 %v609_v9  ;;  %v19_v8 = vld [vmem:[%s1646_s0 + $0x30] sm:$0xff]  ;;  %v757_v9 = vpack.c.bf16 %v28_v2, %v20_v1  ;;  %v42_v12 = vld [vmem:[%s1646_s0 + $0xe8] sm:$0xff]  ;;  %v1266_v15 = vld [vmem:[%s1647_s1] sm:$0xff]  ;;  %v695_v17 = vpack.c.bf16 %v25_v7, %v17_v6 }
  0x30   :  { %674 = vmatprep.subr.bf16.mxu1 %v673_v13  ;;  %v36_v13 = vld [vmem:[%s1646_s0 + $0xb8] sm:$0xff]  ;;  %v759_v18 = vpack.c.bf16 %v27_v10, %v19_v8  ;;  %v35_v22 = vld [vmem:[%s1646_s0 + $0xb0] sm:$0xff]  ;;  %v58_v26 = vld [vmem:[%s1646_s0 + $0x168] sm:$0xff] }
  0x31   :  { %v761_v23 = vpack.c.bf16 %v44_v14, %v36_v13  ;;  %v43_v24 = vld [vmem:[%s1646_s0 + $0xf0] sm:$0xff]  ;;  %v52_v27 = vld [vmem:[%s1646_s0 + $0x138] sm:$0xff]  ;;  %v74_v38 = vld [vmem:[%s1646_s0 + $0x1e8] sm:$0xff] }
  0x32   :  { %612 = vmatpush1.bf16.msra.mxu0 %v611_v19  ;;  %v697_v19 = vpack.c.bf16 %v42_v12, %v34_v11  ;;  %v60_v28 = vld [vmem:[%s1646_s0 + $0x178] sm:$0xff]  ;;  %v763_v30 = vpack.c.bf16 %v43_v24, %v35_v22  ;;  %v51_v34 = vld [vmem:[%s1646_s0 + $0x130] sm:$0xff]  ;;  %v82_v48 = vld [vmem:[%s1646_s0 + $0x228] sm:$0xff] }
  0x33   :  { %676 = vmatpush1.bf16.msra.mxu1 %v675_v20  ;;  %614 = vmatprep.subr.bf16.mxu0 %v613_v21  ;;  %v33_v20 = vld [vmem:[%s1646_s0 + $0xa0] sm:$0xff]  ;;  %v765_v35 = vpack.c.bf16 %v60_v28, %v52_v27  ;;  %v59_v36 = vld [vmem:[%s1646_s0 + $0x170] sm:$0xff]  ;;  %v68_v39 = vld [vmem:[%s1646_s0 + $0x1b8] sm:$0xff] }
  0x34   :  { %678 = vmatprep.subr.bf16.mxu1 %v677_v25  ;;  %v41_v21 = vld [vmem:[%s1646_s0 + $0xe0] sm:$0xff]  ;;  %v50_v25 = vld [vmem:[%s1646_s0 + $0x128] sm:$0xff]  ;;  %v76_v40 = vld [vmem:[%s1646_s0 + $0x1f8] sm:$0xff]  ;;  %v767_v42 = vpack.c.bf16 %v59_v36, %v51_v34 }
  0x35   :  { %v699_v29 = vpack.c.bf16 %v41_v21, %v33_v20  ;;  %v67_v46 = vld [vmem:[%s1646_s0 + $0x1b0] sm:$0xff]  ;;  %v84_v50 = vld [vmem:[%s1646_s0 + $0x238] sm:$0xff]  ;;  %v98_v60 = vld [vmem:[%s1646_s0 + $0x2a8] sm:$0xff] }
  0x36   :  { %616 = vmatpush1.bf16.msra.mxu0 %v615_v31  ;;  %v701_v31 = vpack.c.bf16 %v58_v26, %v50_v25  ;;  %v75_v47 = vld [vmem:[%s1646_s0 + $0x1f0] sm:$0xff]  ;;  %v92_v51 = vld [vmem:[%s1646_s0 + $0x278] sm:$0xff]  ;;  %v114_v8 = vld [vmem:[%s1646_s0 + $0x328] sm:$0xff] }
  0x37   :  { %680 = vmatpush1.bf16.msra.mxu1 %v679_v32  ;;  %618 = vmatprep.subr.bf16.mxu0 %v617_v33  ;;  %v49_v32 = vld [vmem:[%s1646_s0 + $0x120] sm:$0xff]  ;;  %v771_v53 = vpack.c.bf16 %v75_v47, %v67_v46  ;;  %v773_v58 = vpack.c.bf16 %v92_v51, %v84_v50  ;;  %v91_v59 = vld [vmem:[%s1646_s0 + $0x270] sm:$0xff]  ;;  %v100_v62 = vld [vmem:[%s1646_s0 + $0x2b8] sm:$0xff] }
  0x38   :  { %682 = vmatprep.subr.bf16.mxu1 %v681_v37  ;;  %v57_v33 = vld [vmem:[%s1646_s0 + $0x160] sm:$0xff]  ;;  %v66_v37 = vld [vmem:[%s1646_s0 + $0x1a8] sm:$0xff]  ;;  %v108_v63 = vld [vmem:[%s1646_s0 + $0x2f8] sm:$0xff] }
  0x39   :  { %v703_v41 = vpack.c.bf16 %v57_v33, %v49_v32  ;;  %v777_v6 = vpack.c.bf16 %v108_v63, %v100_v62  ;;  %v107_v7 = vld [vmem:[%s1646_s0 + $0x2f0] sm:$0xff]  ;;  %v116_v10 = vld [vmem:[%s1646_s0 + $0x338] sm:$0xff]  ;;  %v130_v22 = vld [vmem:[%s1646_s0 + $0x3a8] sm:$0xff] }
  0x3a   :  { %620 = vmatpush1.bf16.msra.mxu0 %v619_v43  ;;  %v705_v43 = vpack.c.bf16 %v74_v38, %v66_v37  ;;  %v124_v11 = vld [vmem:[%s1646_s0 + $0x378] sm:$0xff]  ;;  %v123_v21 = vld [vmem:[%s1646_s0 + $0x370] sm:$0xff]  ;;  %v146_v34 = vld [vmem:[%s1646_s0 + $0x428] sm:$0xff] }
  0x3b   :  { %684 = vmatpush1.bf16.msra.mxu1 %v683_v44  ;;  %622 = vmatprep.subr.bf16.mxu0 %v621_v45  ;;  %v65_v44 = vld [vmem:[%s1646_s0 + $0x1a0] sm:$0xff]  ;;  %v781_v20 = vpack.c.bf16 %v124_v11, %v116_v10  ;;  %v132_v24 = vld [vmem:[%s1646_s0 + $0x3b8] sm:$0xff]  ;;  %v139_v33 = vld [vmem:[%s1646_s0 + $0x3f0] sm:$0xff] }
  0x3c   :  { %686 = vmatprep.subr.bf16.mxu1 %v685_v49  ;;  %v73_v45 = vld [vmem:[%s1646_s0 + $0x1e0] sm:$0xff]  ;;  %v90_v49 = vld [vmem:[%s1646_s0 + $0x268] sm:$0xff]  ;;  %v140_v25 = vld [vmem:[%s1646_s0 + $0x3f8] sm:$0xff] }
  0x3d   :  { %v707_v52 = vpack.c.bf16 %v73_v45, %v65_v44  ;;  %v709_v54 = vpack.c.bf16 %v90_v49, %v82_v48  ;;  %v785_v32 = vpack.c.bf16 %v140_v25, %v132_v24  ;;  %v148_v36 = vld [vmem:[%s1646_s0 + $0x438] sm:$0xff]  ;;  %v155_v45 = vld [vmem:[%s1646_s0 + $0x470] sm:$0xff]  ;;  %v162_v46 = vld [vmem:[%s1646_s0 + $0x4a8] sm:$0xff] }
  0x3e   :  { %624 = vmatpush1.bf16.msra.mxu0 %v623_v55  ;;  %v81_v55 = vld [vmem:[%s1646_s0 + $0x220] sm:$0xff]  ;;  %v156_v37 = vld [vmem:[%s1646_s0 + $0x478] sm:$0xff] }
  0x3f   :  { %688 = vmatpush1.bf16.msra.mxu1 %v687_v56  ;;  %626 = vmatprep.subr.bf16.mxu0 %v625_v57  ;;  %v89_v56 = vld [vmem:[%s1646_s0 + $0x260] sm:$0xff]  ;;  %v83_v57 = vld [vmem:[%s1646_s0 + $0x230] sm:$0xff]  ;;  %v789_v44 = vpack.c.bf16 %v156_v37, %v148_v36  ;;  %v164_v47 = vld [vmem:[%s1646_s0 + $0x4b8] sm:$0xff] }
  0x40   :  { %690 = vmatprep.subr.bf16.mxu1 %v689_v61  ;;  %v106_v61 = vld [vmem:[%s1646_s0 + $0x2e8] sm:$0xff]  ;;  %v711_v0 = vpack.c.bf16 %v89_v56, %v81_v55  ;;  %v775_v1 = vpack.c.bf16 %v91_v59, %v83_v57  ;;  %v172_v48 = vld [vmem:[%s1646_s0 + $0x4f8] sm:$0xff]  ;;  %v171_v56 = vld [vmem:[%s1646_s0 + $0x4f0] sm:$0xff] }
  0x41   :  { %v713_v2 = vpack.c.bf16 %v106_v61, %v98_v60  ;;  %v793_v55 = vpack.c.bf16 %v172_v48, %v164_v47  ;;  %v178_v57 = vld [vmem:[%s1646_s0 + $0x528] sm:$0xff]  ;;  %v180_v59 = vld [vmem:[%s1646_s0 + $0x538] sm:$0xff] }
  0x42   :  { %628 = vmatpush1.bf16.msra.mxu0 %v627_v3  ;;  %v97_v3 = vld [vmem:[%s1646_s0 + $0x2a0] sm:$0xff]  ;;  %v188_v60 = vld [vmem:[%s1646_s0 + $0x578] sm:$0xff] }
  0x43   :  { %692 = vmatpush1.bf16.msra.mxu1 %v691_v4  ;;  %694 = vmatprep.subr.bf16.mxu0 %v693_v5  ;;  %v105_v4 = vld [vmem:[%s1646_s0 + $0x2e0] sm:$0xff]  ;;  %v99_v5 = vld [vmem:[%s1646_s0 + $0x2b0] sm:$0xff] }
  0x44   :  { %758 = vmatprep.subr.bf16.mxu1 %v757_v9  ;;  %v122_v9 = vld [vmem:[%s1646_s0 + $0x368] sm:$0xff]  ;;  %v715_v12 = vpack.c.bf16 %v105_v4, %v97_v3  ;;  %v779_v13 = vpack.c.bf16 %v107_v7, %v99_v5  ;;  %v797_v3 = vpack.c.bf16 %v188_v60, %v180_v59  ;;  %v187_v4 = vld [vmem:[%s1646_s0 + $0x570] sm:$0xff]  ;;  %v196_v7 = vld [vmem:[%s1646_s0 + $0x5b8] sm:$0xff] }
  0x45   :  { %334 = vmatmul.mubr.f32.vlgmr.msra.gmra.mrb[0].mxu0 %v1266_v15  ;;  %v717_v14 = vpack.c.bf16 %v122_v9, %v114_v8  ;;  %v194_v5 = vld [vmem:[%s1646_s0 + $0x5a8] sm:$0xff]  ;;  %v204_v8 = vld [vmem:[%s1646_s0 + $0x5f8] sm:$0xff] }
  0x46   :  { %405 = vmatmul.mubr.f32.vlgmr.msra.gmra.mrb[0].mxu1 %v1266_v15  ;;  %696 = vmatpush1.bf16.msra.mxu0 %v695_v17  ;;  %v113_v17 = vld [vmem:[%s1646_s0 + $0x320] sm:$0xff] }
  0x47   :  { %760 = vmatpush1.bf16.msra.mxu1 %v759_v18  ;;  %698 = vmatprep.subr.bf16.mxu0 %v697_v19  ;;  %v121_v18 = vld [vmem:[%s1646_s0 + $0x360] sm:$0xff]  ;;  %v115_v19 = vld [vmem:[%s1646_s0 + $0x330] sm:$0xff] }
  0x48   :  { %762 = vmatprep.subr.bf16.mxu1 %v761_v23  ;;  %475 = vmatprep.mubr.f32.mxu0 %v1133_v16  ;;  %v138_v23 = vld [vmem:[%s1646_s0 + $0x3e8] sm:$0xff]  ;;  %v719_v26 = vpack.c.bf16 %v121_v18, %v113_v17  ;;  %v783_v27 = vpack.c.bf16 %v123_v21, %v115_v19  ;;  %v801_v17 = vpack.c.bf16 %v204_v8, %v196_v7  ;;  %v203_v18 = vld [vmem:[%s1646_s0 + $0x5f0] sm:$0xff]  ;;  %v212_v21 = vld [vmem:[%s1646_s0 + $0x638] sm:$0xff] }
  0x49   :  { %546 = vmatprep.mubr.f32.mxu1 %v1133_v16  ;;  %v769_v16 = vpack.c.bf16 %v76_v40, %v68_v39  ;;  %v721_v28 = vpack.c.bf16 %v138_v23, %v130_v22  ;;  %v210_v19 = vld [vmem:[%s1646_s0 + $0x628] sm:$0xff]  ;;  %v220_v22 = vld [vmem:[%s1646_s0 + $0x678] sm:$0xff] }
  0x4a   :  { %700 = vmatpush1.bf16.msra.mxu0 %v699_v29  ;;  %v129_v29 = vld [vmem:[%s1646_s0 + $0x3a0] sm:$0xff] }
  0x4b   :  { %764 = vmatpush1.bf16.msra.mxu1 %v763_v30  ;;  %702 = vmatprep.subr.bf16.mxu0 %v701_v31  ;;  %v137_v30 = vld [vmem:[%s1646_s0 + $0x3e0] sm:$0xff]  ;;  %v131_v31 = vld [vmem:[%s1646_s0 + $0x3b0] sm:$0xff] }
  0x4c   :  { %766 = vmatprep.subr.bf16.mxu1 %v765_v35  ;;  %v154_v35 = vld [vmem:[%s1646_s0 + $0x468] sm:$0xff]  ;;  %v723_v38 = vpack.c.bf16 %v137_v30, %v129_v29  ;;  %v787_v39 = vpack.c.bf16 %v139_v33, %v131_v31  ;;  %v805_v29 = vpack.c.bf16 %v220_v22, %v212_v21  ;;  %v219_v30 = vld [vmem:[%s1646_s0 + $0x670] sm:$0xff]  ;;  %v228_v33 = vld [vmem:[%s1646_s0 + $0x6b8] sm:$0xff] }
  0x4d   :  { %v725_v40 = vpack.c.bf16 %v154_v35, %v146_v34  ;;  %v226_v31 = vld [vmem:[%s1646_s0 + $0x6a8] sm:$0xff]  ;;  %v236_v34 = vld [vmem:[%s1646_s0 + $0x6f8] sm:$0xff] }
  0x4e   :  { %704 = vmatpush1.bf16.msra.mxu0 %v703_v41  ;;  %v145_v41 = vld [vmem:[%s1646_s0 + $0x420] sm:$0xff] }
  0x4f   :  { %768 = vmatpush1.bf16.msra.mxu1 %v767_v42  ;;  %706 = vmatprep.subr.bf16.mxu0 %v705_v43  ;;  %v153_v42 = vld [vmem:[%s1646_s0 + $0x460] sm:$0xff]  ;;  %v147_v43 = vld [vmem:[%s1646_s0 + $0x430] sm:$0xff] }
  0x50   :  { %770 = vmatprep.subr.bf16.mxu1 %v769_v16  ;;  %v170_v16 = vld [vmem:[%s1646_s0 + $0x4e8] sm:$0xff]  ;;  %v727_v49 = vpack.c.bf16 %v153_v42, %v145_v41  ;;  %v791_v50 = vpack.c.bf16 %v155_v45, %v147_v43  ;;  %v809_v41 = vpack.c.bf16 %v236_v34, %v228_v33  ;;  %v235_v42 = vld [vmem:[%s1646_s0 + $0x6f0] sm:$0xff]  ;;  %v244_v45 = vld [vmem:[%s1646_s0 + $0x738] sm:$0xff] }
  0x51   :  { %v729_v51 = vpack.c.bf16 %v170_v16, %v162_v46  ;;  %v242_v43 = vld [vmem:[%s1646_s0 + $0x728] sm:$0xff]  ;;  %v252_v46 = vld [vmem:[%s1646_s0 + $0x778] sm:$0xff] }
  0x52   :  { %708 = vmatpush1.bf16.msra.mxu0 %v707_v52  ;;  %v161_v52 = vld [vmem:[%s1646_s0 + $0x4a0] sm:$0xff] }
  0x53   :  { %772 = vmatpush1.bf16.msra.mxu1 %v771_v53  ;;  %710 = vmatprep.subr.bf16.mxu0 %v709_v54  ;;  %v169_v53 = vld [vmem:[%s1646_s0 + $0x4e0] sm:$0xff]  ;;  %v163_v54 = vld [vmem:[%s1646_s0 + $0x4b0] sm:$0xff] }
  0x54   :  { %774 = vmatprep.subr.bf16.mxu1 %v773_v58  ;;  %v186_v58 = vld [vmem:[%s1646_s0 + $0x568] sm:$0xff]  ;;  %v731_v61 = vpack.c.bf16 %v169_v53, %v161_v52  ;;  %v795_v62 = vpack.c.bf16 %v171_v56, %v163_v54  ;;  %v813_v52 = vpack.c.bf16 %v252_v46, %v244_v45  ;;  %v251_v53 = vld [vmem:[%s1646_s0 + $0x770] sm:$0xff]  ;;  %v260_v56 = vld [vmem:[%s1646_s0 + $0x7b8] sm:$0xff] }
  0x55   :  { %v733_v63 = vpack.c.bf16 %v186_v58, %v178_v57  ;;  %v258_v54 = vld [vmem:[%s1646_s0 + $0x7a8] sm:$0xff]  ;;  %v268_v57 = vld [vmem:[%s1646_s0 + $0x7f8] sm:$0xff] }
  0x56   :  { %712 = vmatpush1.bf16.msra.mxu0 %v711_v0  ;;  %v177_v0 = vld [vmem:[%s1646_s0 + $0x520] sm:$0xff] }
  0x57   :  { %776 = vmatpush1.bf16.msra.mxu1 %v775_v1  ;;  %714 = vmatprep.subr.bf16.mxu0 %v713_v2  ;;  %v185_v1 = vld [vmem:[%s1646_s0 + $0x560] sm:$0xff]  ;;  %v179_v2 = vld [vmem:[%s1646_s0 + $0x530] sm:$0xff] }
  0x58   :  { %778 = vmatprep.subr.bf16.mxu1 %v777_v6  ;;  %v202_v6 = vld [vmem:[%s1646_s0 + $0x5e8] sm:$0xff]  ;;  %v735_v9 = vpack.c.bf16 %v185_v1, %v177_v0  ;;  %v799_v10 = vpack.c.bf16 %v187_v4, %v179_v2  ;;  %v259_v0 = vld [vmem:[%s1646_s0 + $0x7b0] sm:$0xff] }
  0x59   :  { %v737_v11 = vpack.c.bf16 %v202_v6, %v194_v5  ;;  %v267_v1 = vld [vmem:[%s1646_s0 + $0x7f0] sm:$0xff] }
  0x5a   :  { %716 = vmatpush1.bf16.msra.mxu0 %v715_v12  ;;  %v193_v12 = vld [vmem:[%s1646_s0 + $0x5a0] sm:$0xff] }
  0x5b   :  { %780 = vmatpush1.bf16.msra.mxu1 %v779_v13  ;;  %718 = vmatprep.subr.bf16.mxu0 %v717_v14  ;;  %v201_v13 = vld [vmem:[%s1646_s0 + $0x5e0] sm:$0xff]  ;;  %v195_v14 = vld [vmem:[%s1646_s0 + $0x5b0] sm:$0xff] }
  0x5c   :  { %782 = vmatprep.subr.bf16.mxu1 %v781_v20  ;;  %v218_v20 = vld [vmem:[%s1646_s0 + $0x668] sm:$0xff]  ;;  %v739_v23 = vpack.c.bf16 %v201_v13, %v193_v12  ;;  %v803_v24 = vpack.c.bf16 %v203_v18, %v195_v14 }
  0x5d   :  { %v741_v25 = vpack.c.bf16 %v218_v20, %v210_v19 }
  0x5e   :  { %720 = vmatpush1.bf16.msra.mxu0 %v719_v26  ;;  %v209_v26 = vld [vmem:[%s1646_s0 + $0x620] sm:$0xff] }
  0x5f   :  { %784 = vmatpush1.bf16.msra.mxu1 %v783_v27  ;;  %722 = vmatprep.subr.bf16.mxu0 %v721_v28  ;;  %v217_v27 = vld [vmem:[%s1646_s0 + $0x660] sm:$0xff]  ;;  %v211_v28 = vld [vmem:[%s1646_s0 + $0x630] sm:$0xff] }
  0x60   :  { %786 = vmatprep.subr.bf16.mxu1 %v785_v32  ;;  %v234_v32 = vld [vmem:[%s1646_s0 + $0x6e8] sm:$0xff]  ;;  %v743_v35 = vpack.c.bf16 %v217_v27, %v209_v26  ;;  %v807_v36 = vpack.c.bf16 %v219_v30, %v211_v28 }
  0x61   :  { %v745_v37 = vpack.c.bf16 %v234_v32, %v226_v31 }
  0x62   :  { %724 = vmatpush1.bf16.msra.mxu0 %v723_v38  ;;  %v225_v38 = vld [vmem:[%s1646_s0 + $0x6a0] sm:$0xff] }
  0x63   :  { %788 = vmatpush1.bf16.msra.mxu1 %v787_v39  ;;  %726 = vmatprep.subr.bf16.mxu0 %v725_v40  ;;  %v233_v39 = vld [vmem:[%s1646_s0 + $0x6e0] sm:$0xff]  ;;  %v227_v40 = vld [vmem:[%s1646_s0 + $0x6b0] sm:$0xff] }
  0x64   :  { %790 = vmatprep.subr.bf16.mxu1 %v789_v44  ;;  %v250_v44 = vld [vmem:[%s1646_s0 + $0x768] sm:$0xff]  ;;  %v747_v16 = vpack.c.bf16 %v233_v39, %v225_v38  ;;  %v811_v47 = vpack.c.bf16 %v235_v42, %v227_v40 }
  0x65   :  { %v749_v48 = vpack.c.bf16 %v250_v44, %v242_v43 }
  0x66   :  { %728 = vmatpush1.bf16.msra.mxu0 %v727_v49  ;;  %v241_v49 = vld [vmem:[%s1646_s0 + $0x720] sm:$0xff] }
  0x67   :  { %792 = vmatpush1.bf16.msra.mxu1 %v791_v50  ;;  %730 = vmatprep.subr.bf16.mxu0 %v729_v51  ;;  %v249_v50 = vld [vmem:[%s1646_s0 + $0x760] sm:$0xff]  ;;  %v243_v51 = vld [vmem:[%s1646_s0 + $0x730] sm:$0xff] }
  0x68   :  { %794 = vmatprep.subr.bf16.mxu1 %v793_v55  ;;  %v266_v55 = vld [vmem:[%s1646_s0 + $0x7e8] sm:$0xff]  ;;  %v751_v58 = vpack.c.bf16 %v249_v50, %v241_v49  ;;  %v815_v59 = vpack.c.bf16 %v251_v53, %v243_v51 }
  0x69   :  { %v753_v60 = vpack.c.bf16 %v266_v55, %v258_v54 }
  0x6a   :  { %732 = vmatpush1.bf16.msra.mxu0 %v731_v61  ;;  %v257_v61 = vld [vmem:[%s1646_s0 + $0x7a0] sm:$0xff] }
  0x6b   :  { %796 = vmatpush1.bf16.msra.mxu1 %v795_v62  ;;  %734 = vmatprep.subr.bf16.mxu0 %v733_v63  ;;  %v265_v62 = vld [vmem:[%s1646_s0 + $0x7e0] sm:$0xff]  ;;  %v817_v63 = vpack.c.bf16 %v268_v57, %v260_v56 }
  0x6c   :  { %798 = vmatprep.subr.bf16.mxu1 %v797_v3  ;;  %v755_v2 = vpack.c.bf16 %v265_v62, %v257_v61  ;;  %v819_v3 = vpack.c.bf16 %v267_v1, %v259_v0 }
  0x6e   :  { %736 = vmatpush1.bf16.msra.mxu0 %v735_v9 }
  0x6f   :  { %800 = vmatpush1.bf16.msra.mxu1 %v799_v10  ;;  %738 = vmatprep.subr.bf16.mxu0 %v737_v11 }
  0x70   :  { %802 = vmatprep.subr.bf16.mxu1 %v801_v17 }
  0x72   :  { %740 = vmatpush1.bf16.msra.mxu0 %v739_v23 }
  0x73   :  { %804 = vmatpush1.bf16.msra.mxu1 %v803_v24  ;;  %742 = vmatprep.subr.bf16.mxu0 %v741_v25 }
  0x74   :  { %806 = vmatprep.subr.bf16.mxu1 %v805_v29 }
  0x76   :  { %744 = vmatpush1.bf16.msra.mxu0 %v743_v35 }
  0x77   :  { %808 = vmatpush1.bf16.msra.mxu1 %v807_v36  ;;  %746 = vmatprep.subr.bf16.mxu0 %v745_v37 }
  0x78   :  { %810 = vmatprep.subr.bf16.mxu1 %v809_v41 }
  0x7a   :  { %748 = vmatpush1.bf16.msra.mxu0 %v747_v16 }
  0x7b   :  { %812 = vmatpush1.bf16.msra.mxu1 %v811_v47  ;;  %750 = vmatprep.subr.bf16.mxu0 %v749_v48 }
  0x7c   :  { %814 = vmatprep.subr.bf16.mxu1 %v813_v52 }
  0x7e   :  { %752 = vmatpush1.bf16.msra.mxu0 %v751_v58 }
  0x7f   :  { %816 = vmatpush1.bf16.msra.mxu1 %v815_v59  ;;  %754 = vmatprep.subr.bf16.mxu0 %v753_v60 }
  0x80   :  { %818 = vmatprep.subr.bf16.mxu1 %v817_v63 }
  0x82   :  { %756 = vmatpush1.bf16.msra.mxu0 %v755_v2 }
  0x83   :  { %820 = vmatpush1.bf16.msra.mxu1 %v819_v3 }
  0x85   :  { %476 = vmatmul.mubr.f32.vlgmr.msra.gmra.mrb[2].mxu0 %v1266_v15 }
  0x86   :  { %547 = vmatmul.mubr.f32.vlgmr.msra.gmra.mrb[2].mxu1 %v1266_v15 }
 0x118   :  { %v335_v4 = vpop.f32.mrb[0].mxu0 }
 0x119   :  { %553 = vst [vmem:[%s1648_s2] sm:$0xff] %v335_v4  ;;  %v406_v5 = vpop.f32.mrb[0].mxu1  ;;  %v337_v6 = vpop.f32.mrb[1].mxu0 }
 0x11a   :  { %555 = vst [vmem:[%s1648_s2 + $0x10] sm:$0xff] %v406_v5  ;;  %554 = vst [vmem:[%s1648_s2 + $0x8] sm:$0xff] %v337_v6  ;;  %v408_v7 = vpop.f32.mrb[1].mxu1 }
 0x11b   :  { %556 = vst [vmem:[%s1648_s2 + $0x18] sm:$0xff] %v408_v7 }
 0x158   :  { %v477_v15 = vpop.f32.mrb[2].mxu0 }
 0x159   :  { %557 = vst [vmem:[%s1648_s2 + $0x20] sm:$0xff] %v477_v15  ;;  %v548_v8 = vpop.f32.mrb[2].mxu1  ;;  %v479_v9 = vpop.f32.mrb[3].mxu0 }
 0x15a   :  { %559 = vst [vmem:[%s1648_s2 + $0x30] sm:$0xff] %v548_v8  ;;  %558 = vst [vmem:[%s1648_s2 + $0x28] sm:$0xff] %v479_v9  ;;  %v550_v10 = vpop.f32.mrb[3].mxu1 }
 0x15b   :  { %560 = vst [vmem:[%s1648_s2 + $0x38] sm:$0xff] %v550_v10 }

</bundles_post_ra>
